<compile_context>
chip_gen: v6e
topology: v6e:2x2x1
jax: 0.10.0
libtpu: 0.0.40
codegen_flags: <defaults>
</compile_context>

<pallas_src>
import functools

import jax
import jax.numpy as jnp
from jax.experimental import pallas as pl
from jax.experimental.pallas import tpu as pltpu


def _round_up(n, m):
    return ((n + m - 1) // m) * m


def _team_kernel(x_ref, we_ref, be_ref, wcat_ref, bcat_ref,
                 rec_ref, logit_ref, loss_ref,
                 *, d_in_p, bt, b_true, mask_rows):
    # ---- encoder (f32): raw = x @ We + be ; true_enc = tanh(raw) --------------
    # We/be padded columns are exactly zero, so padded raw columns are exactly
    # zero and do not perturb the loss (invariant kept by pack_params).
    x = x_ref[...]
    raw = jnp.dot(x, we_ref[...], preferred_element_type=jnp.float32) + be_ref[...]
    true_enc = jnp.tanh(raw)

    sq = raw * raw
    if mask_rows:
        # zero-padded batch rows must not contribute to sum(raw**2): be != 0
        # makes their raw nonzero, so mask by global row index.
        row = (jax.lax.broadcasted_iota(jnp.int32, (bt, 1), 0)
               + pl.program_id(0) * bt)
        sq = jnp.where(row < b_true, sq, 0.0)
    loss_ref[0, 0] = jnp.sum(sq)

    # ---- fused decoder|listener: one MXU pass, bf16 operands, f32 accumulate --
    y = (jnp.dot(true_enc.astype(jnp.bfloat16), wcat_ref[...],
                 preferred_element_type=jnp.float32)
         + bcat_ref[...])
    # split at a 128-aligned column -> both stores stay lane-dense (unmasked vst)
    rec_ref[...] = y[:, :d_in_p]
    logit_ref[...] = y[:, d_in_p:]


def pack_params(params):
    """One-time packing: pad to 128 lanes, concat decoder|listener, cast."""
    we, be, wd, bd, wl, bl = (params["we"], params["be"], params["wd"],
                              params["bd"], params["wl"], params["bl"])
    d_in, hidden = we.shape
    n_cls = wl.shape[1]
    d_in_p = _round_up(d_in, 128)
    hid_p = _round_up(hidden, 128)
    cls_p = _round_up(n_cls, 128)

    # all pads are zeros => matmuls are numerically unaffected and padded raw
    # columns stay exactly zero (enc_loss invariant).
    we_p = jnp.pad(we.astype(jnp.float32),
                   ((0, d_in_p - d_in), (0, hid_p - hidden)))
    be_p = jnp.pad(be.astype(jnp.float32), ((0, 0), (0, hid_p - hidden)))
    wcat = jnp.concatenate(
        [jnp.pad(wd, ((0, hid_p - hidden), (0, d_in_p - d_in))),
         jnp.pad(wl, ((0, hid_p - hidden), (0, cls_p - n_cls)))],
        axis=1).astype(jnp.bfloat16)                       # [hid_p, d_in_p+cls_p]
    bcat = jnp.concatenate(
        [jnp.pad(bd, ((0, 0), (0, d_in_p - d_in))),
         jnp.pad(bl, ((0, 0), (0, cls_p - n_cls)))],
        axis=1).astype(jnp.float32)                        # [1, d_in_p+cls_p]
    return {"we_p": we_p, "be_p": be_p, "wcat": wcat, "bcat": bcat}


def team_forward(x_nchw, packed, *, hidden, n_cls, bt_cap=512):
    """x_nchw: [B, C, H, W] float32. Returns (prediction, recons, enc_loss)."""
    B = x_nchw.shape[0]
    x_flat = x_nchw.reshape(B, -1)                  # matches torch .view(B, -1)
    d_in = x_flat.shape[1]

    we_p, be_p = packed["we_p"], packed["be_p"]
    wcat, bcat = packed["wcat"], packed["bcat"]
    d_in_p, hid_p = we_p.shape
    out_p = wcat.shape[1]
    cls_p = out_p - d_in_p

    # batch tiling: one full block for small B; otherwise 512-row blocks with B
    # zero-padded up to a multiple of the tile (padded-row loss masked in-kernel).
    if B <= bt_cap:
        bt, B_pad = B, B
    else:
        bt = bt_cap
        B_pad = _round_up(B, bt)
    nb = B_pad // bt

    xp = jnp.pad(x_flat.astype(jnp.float32),
                 ((0, B_pad - B), (0, d_in_p - d_in)))

    kernel = functools.partial(_team_kernel, d_in_p=d_in_p, bt=bt,
                               b_true=B, mask_rows=(B_pad != B))

    flops = 2 * B_pad * hid_p * (d_in_p + out_p)
    bytes_accessed = (xp.size * 4 + we_p.size * 4 + be_p.size * 4
                      + wcat.size * 2 + bcat.size * 4
                      + B_pad * (d_in_p + cls_p) * 4 + nb * 4)
    cost = pl.CostEstimate(flops=flops, transcendentals=B_pad * hid_p,
                           bytes_accessed=bytes_accessed)

    recons_pad, logits_pad, loss_parts = pl.pallas_call(
        kernel,
        grid=(nb,),
        in_specs=[
            pl.BlockSpec((bt, d_in_p), lambda i: (i, 0)),      # x block (f32)
            pl.BlockSpec((d_in_p, hid_p), lambda i: (0, 0)),   # We      (resident)
            pl.BlockSpec((1, hid_p), lambda i: (0, 0)),        # be      (resident)
            pl.BlockSpec((hid_p, out_p), lambda i: (0, 0)),    # Wd|Wl   (resident)
            pl.BlockSpec((1, out_p), lambda i: (0, 0)),        # bd|bl   (resident)
        ],
        out_specs=(
            pl.BlockSpec((bt, d_in_p), lambda i: (i, 0)),      # recons (lane-dense)
            pl.BlockSpec((bt, cls_p), lambda i: (i, 0)),       # logits (lane-dense)
            pl.BlockSpec((1, 1), lambda i: (i, 0),
                         memory_space=pltpu.MemorySpace.SMEM), # loss partials
        ),
        out_shape=(
            jax.ShapeDtypeStruct((B_pad, d_in_p), jnp.float32),
            jax.ShapeDtypeStruct((B_pad, cls_p), jnp.float32),
            jax.ShapeDtypeStruct((nb, 1), jnp.float32),
        ),
        compiler_params=pltpu.CompilerParams(
            dimension_semantics=("parallel",),
            # explicit scoped-VMEM request: bt=512 working set (~10 MiB with
            # double-buffered f32 slabs) + headroom; within v7x's 64 MiB physical.
            vmem_limit_bytes=32 * 1024 * 1024,
        ),
        cost_estimate=cost,
    )(xp, we_p, be_p, wcat, bcat)

    # row slices are no-ops when B_pad == B; column slices only drop pad lanes.
    prediction = logits_pad[:B, :n_cls]
    recons = recons_pad[:B, :d_in]
    enc_loss = jnp.sum(loss_parts) / jnp.float32(B * hidden)
    return prediction, recons, enc_loss


def init_params(key, d_in, hidden, n_classes):
    k = jax.random.split(key, 6)
    scale_e = 1.0 / jnp.sqrt(jnp.float32(d_in))
    scale_d = 1.0 / jnp.sqrt(jnp.float32(hidden))
    return {
        "we": jax.random.normal(k[0], (d_in, hidden), jnp.float32) * scale_e,
        "be": jax.random.normal(k[1], (1, hidden), jnp.float32) * 0.01,
        "wd": jax.random.normal(k[2], (hidden, d_in), jnp.float32) * scale_d,
        "bd": jax.random.normal(k[3], (1, d_in), jnp.float32) * 0.01,
        "wl": jax.random.normal(k[4], (hidden, n_classes), jnp.float32) * scale_d,
        "bl": jax.random.normal(k[5], (1, n_classes), jnp.float32) * 0.01,
    }


if __name__ == "__main__":
    key = jax.random.PRNGKey(0)
    kx, kp = jax.random.split(key)

    B, C, H, W = 2, 4, 16, 16
    d_in = C * H * W           # 1024
    hidden = 32
    n_classes = 8

    x = jax.random.normal(kx, (B, C, H, W), jnp.float32)
    params = init_params(kp, d_in, hidden, n_classes)
    packed = pack_params(params)            # one-time weight packing (not per call)

    fwd = jax.jit(functools.partial(team_forward, hidden=hidden, n_cls=n_classes))
    pred, recons, enc_loss = fwd(x, packed)
    jax.block_until_ready((pred, recons, enc_loss))

    # reference: f32 encoder (high-precision dot), bf16-operand / f32-accumulate
    # decoder|listener (same contract as the kernel).
    xf = x.reshape(B, -1)
    raw = jnp.dot(xf, params["we"],
                  precision=jax.lax.Precision.HIGHEST) + params["be"]
    te = jnp.tanh(raw)
    teb = te.astype(jnp.bfloat16)
    ref_pred = jnp.dot(teb, params["wl"].astype(jnp.bfloat16),
                       preferred_element_type=jnp.float32) + params["bl"]
    ref_rec = jnp.dot(teb, params["wd"].astype(jnp.bfloat16),
                      preferred_element_type=jnp.float32) + params["bd"]
    ref_loss = jnp.mean(raw * raw)

    assert jnp.allclose(pred, ref_pred, atol=2e-2, rtol=2e-2)
    assert jnp.allclose(recons, ref_rec, atol=2e-2, rtol=2e-2)
    assert jnp.allclose(enc_loss, ref_loss, atol=1e-2, rtol=1e-2)

    print("KERNEL_OK")
</pallas_src>

<mosaic_0001>
module attributes {stable_mosaic.version = 11 : i64} {
  func.func @_team_kernel(%arg0: i32, %arg1: memref<2x1024xf32, #tpu.memory_space<vmem>>, %arg2: memref<1024x128xf32, #tpu.memory_space<vmem>>, %arg3: memref<1x128xf32, #tpu.memory_space<vmem>>, %arg4: memref<128x1152xbf16, #tpu.memory_space<vmem>>, %arg5: memref<1x1152xf32, #tpu.memory_space<vmem>>, %arg6: memref<2x1024xf32, #tpu.memory_space<vmem>>, %arg7: memref<2x128xf32, #tpu.memory_space<vmem>>, %arg8: memref<1x1xf32, #tpu.memory_space<smem>>) attributes {dimension_semantics = [#tpu.dimension_semantics<parallel>], iteration_bounds = array<i64: 1>, scalar_prefetch = 0 : i64, scratch_operands = 0 : i64, tpu.core_type = #tpu.core_type<tc>, window_params = [{transform_indices = @transform_0, window_bounds = array<i64: 2, 1024>}, {pipeline_mode = #tpu.pipeline_mode<synchronous>, transform_indices = @transform_1, window_bounds = array<i64: 1024, 128>}, {pipeline_mode = #tpu.pipeline_mode<synchronous>, transform_indices = @transform_2, window_bounds = array<i64: 1, 128>}, {pipeline_mode = #tpu.pipeline_mode<synchronous>, transform_indices = @transform_3, window_bounds = array<i64: 128, 1152>}, {pipeline_mode = #tpu.pipeline_mode<synchronous>, transform_indices = @transform_4, window_bounds = array<i64: 1, 1152>}, {transform_indices = @transform_5, window_bounds = array<i64: 2, 1024>}, {transform_indices = @transform_6, window_bounds = array<i64: 2, 128>}, {transform_indices = @transform_7, window_bounds = array<i64: 1, 1>}]} {
    %c0 = arith.constant 0 : index
    %c0_0 = arith.constant 0 : index
    %0 = vector.load %arg1[%c0, %c0_0] : memref<2x1024xf32, #tpu.memory_space<vmem>>, vector<2x1024xf32>
    %c0_1 = arith.constant 0 : index
    %c0_2 = arith.constant 0 : index
    %1 = vector.load %arg2[%c0_1, %c0_2] : memref<1024x128xf32, #tpu.memory_space<vmem>>, vector<1024x128xf32>
    %cst = arith.constant dense<0.000000e+00> : vector<2x128xf32>
    %2 = tpu.matmul %0, %1, %cst {dimension_numbers = #tpu.dot_dimension_numbers<[1], [0], [0], [1], [0, 0, 1, 1], [], []>} : vector<2x1024xf32>, vector<1024x128xf32>, vector<2x128xf32> -> vector<2x128xf32>
    %c0_3 = arith.constant 0 : index
    %c0_4 = arith.constant 0 : index
    %3 = vector.load %arg3[%c0_3, %c0_4] : memref<1x128xf32, #tpu.memory_space<vmem>>, vector<1x128xf32>
    %4 = vector.broadcast %3 : vector<1x128xf32> to vector<2x128xf32>
    %5 = arith.addf %2, %4 : vector<2x128xf32>
    %6 = math.tanh %5 : vector<2x128xf32>
    %7 = arith.mulf %5, %5 : vector<2x128xf32>
    %8 = vector.shape_cast %7 : vector<2x128xf32> to vector<1x2x128xf32>
    %cst_5 = arith.constant dense<0.000000e+00> : vector<1xf32>
    %9 = vector.multi_reduction <add>, %8, %cst_5 [1, 2] : vector<1x2x128xf32> to vector<1xf32>
    %10 = vector.shape_cast %9 : vector<1xf32> to vector<1x1x1xf32>
    %11 = vector.extract %10[0, 0, 0] : f32 from vector<1x1x1xf32>
    %c0_6 = arith.constant 0 : index
    %c0_7 = arith.constant 0 : index
    %12 = memref.load %arg8[%c0_6, %c0_7] : memref<1x1xf32, #tpu.memory_space<smem>>
    memref.store %11, %arg8[%c0_6, %c0_7] : memref<1x1xf32, #tpu.memory_space<smem>>
    %13 = arith.truncf %6 : vector<2x128xf32> to vector<2x128xbf16>
    %c0_8 = arith.constant 0 : index
    %c0_9 = arith.constant 0 : index
    %14 = vector.load %arg4[%c0_8, %c0_9] : memref<128x1152xbf16, #tpu.memory_space<vmem>>, vector<128x1152xbf16>
    %cst_10 = arith.constant dense<0.000000e+00> : vector<2x1152xf32>
    %15 = tpu.matmul %13, %14, %cst_10 {dimension_numbers = #tpu.dot_dimension_numbers<[1], [0], [0], [1], [0, 0, 1, 1], [], []>} : vector<2x128xbf16>, vector<128x1152xbf16>, vector<2x1152xf32> -> vector<2x1152xf32>
    %c0_11 = arith.constant 0 : index
    %c0_12 = arith.constant 0 : index
    %16 = vector.load %arg5[%c0_11, %c0_12] : memref<1x1152xf32, #tpu.memory_space<vmem>>, vector<1x1152xf32>
    %17 = vector.broadcast %16 : vector<1x1152xf32> to vector<2x1152xf32>
    %18 = arith.addf %15, %17 : vector<2x1152xf32>
    %19 = vector.extract_strided_slice %18 {offsets = [0, 0], sizes = [2, 1024], strides = [1, 1]} : vector<2x1152xf32> to vector<2x1024xf32>
    %c0_13 = arith.constant 0 : index
    %c0_14 = arith.constant 0 : index
    %20 = vector.load %arg6[%c0_13, %c0_14] : memref<2x1024xf32, #tpu.memory_space<vmem>>, vector<2x1024xf32>
    tpu.vector_store %arg6[%c0_13, %c0_14], %19 {strides = array<i32>} : memref<2x1024xf32, #tpu.memory_space<vmem>>, vector<2x1024xf32>,
    %21 = vector.extract_strided_slice %18 {offsets = [0, 1024], sizes = [2, 128], strides = [1, 1]} : vector<2x1152xf32> to vector<2x128xf32>
    %c0_15 = arith.constant 0 : index
    %c0_16 = arith.constant 0 : index
    %22 = vector.load %arg7[%c0_15, %c0_16] : memref<2x128xf32, #tpu.memory_space<vmem>>, vector<2x128xf32>
    tpu.vector_store %arg7[%c0_15, %c0_16], %21 {strides = array<i32>} : memref<2x128xf32, #tpu.memory_space<vmem>>, vector<2x128xf32>,
    return
  }
  func.func @transform_0(%arg0: i32) -> (i32, i32) {
    %c0_i32 = arith.constant 0 : i32
    %c0_i32_0 = arith.constant 0 : i32
    return %arg0, %c0_i32 : i32, i32
  }
  func.func @transform_1(%arg0: i32) -> (i32, i32) {
    %c0_i32 = arith.constant 0 : i32
    %c0_i32_0 = arith.constant 0 : i32
    %c0_i32_1 = arith.constant 0 : i32
    return %c0_i32, %c0_i32_0 : i32, i32
  }
  func.func @transform_2(%arg0: i32) -> (i32, i32) {
    %c0_i32 = arith.constant 0 : i32
    %c0_i32_0 = arith.constant 0 : i32
    %c0_i32_1 = arith.constant 0 : i32
    return %c0_i32, %c0_i32_0 : i32, i32
  }
  func.func @transform_3(%arg0: i32) -> (i32, i32) {
    %c0_i32 = arith.constant 0 : i32
    %c0_i32_0 = arith.constant 0 : i32
    %c0_i32_1 = arith.constant 0 : i32
    return %c0_i32, %c0_i32_0 : i32, i32
  }
  func.func @transform_4(%arg0: i32) -> (i32, i32) {
    %c0_i32 = arith.constant 0 : i32
    %c0_i32_0 = arith.constant 0 : i32
    %c0_i32_1 = arith.constant 0 : i32
    return %c0_i32, %c0_i32_0 : i32, i32
  }
  func.func @transform_5(%arg0: i32) -> (i32, i32) {
    %c0_i32 = arith.constant 0 : i32
    %c0_i32_0 = arith.constant 0 : i32
    return %arg0, %c0_i32 : i32, i32
  }
  func.func @transform_6(%arg0: i32) -> (i32, i32) {
    %c0_i32 = arith.constant 0 : i32
    %c0_i32_0 = arith.constant 0 : i32
    return %arg0, %c0_i32 : i32, i32
  }
  func.func @transform_7(%arg0: i32) -> (i32, i32) {
    %c0_i32 = arith.constant 0 : i32
    %c0_i32_0 = arith.constant 0 : i32
    return %arg0, %c0_i32 : i32, i32
  }
}

</mosaic_0001>

<bundles_post_ra>
// kernel: team_forward.1
= control target key start
LH: loop header
LB: loop body
LE: loop exit
PB: predicated region body
PF: predicated region fallthrough
CT: control target
= control target key end

     0   :  { %13 = vsyncpa [#allocation3], 0  ;;  %s1898_s0 = inlined_call_operand.vmem [shape: f32[2,1024], index: 0, kind: input, shape index: {}]   ;;  %s1899_s1 = inlined_call_operand.hbm [shape: f32[1024,128], index: 1, kind: input, shape index: {}]   ;;  %s1900_s2 = inlined_call_operand.vmem [shape: f32[1,128], index: 2, kind: input, shape index: {}]   ;;  %s1901_s3 = inlined_call_operand.hbm [shape: bf16[128,1152], index: 3, kind: input, shape index: {}]   ;;  %s1902_s4 = inlined_call_operand.vmem [shape: f32[1,1152], index: 4, kind: input, shape index: {}]   ;;  %s1903_s5 = inlined_call_operand.hbm [shape: f32[2,1024], index: 5, kind: output, shape index: {0}]   ;;  %s1904_s6 = inlined_call_operand.hbm [shape: f32[2,128], index: 6, kind: output, shape index: {1}]   ;;  %s1905_s7 = inlined_call_operand.hbm [shape: f32[1,1], index: 7, kind: output, shape index: {2}]  }
   0x1   :  { %14 = vsyncpa [#allocation7], 0 }
   0x2   :  { %15 = vsyncpa [#allocation4], 0 }
   0x3   :  { %16 = vsyncpa [#allocation10], 0 }
   0x4   :  { %17 = vsyncpa [#allocation5], 0  ;;  %s1787_s24 = smov [#allocation2]  }
   0x5   :  { %s25_s25 = sshll.u32 %s1787_s24, 4  ;;  %s26_s25 = int_to_ptr.vmem [resolvable:$true] %s25_s25 }
   0x6   :  { %s1697_s26 = scalar_lea.vmem %s26_s25, 16384  ;;  %p1702_p1 = scmp.lt.s32.totalorder %s26_s25, %s26_s25 }
   0x7   :  { %p1698_p0 = scmp.ne.s32.totalorder %s26_s25, %s1697_s26  ;;  %p1703_p2 = scmp.lt.s32.totalorder %s1697_s26, %s1697_s26 }
   0x9   :  { %p1704_p3 = por %p1703_p2, %p1702_p1 }
   0xb   :  { %p1705_p4 = pnand %p1704_p3, %p1698_p0 }
   0xd   :  { %1708 = shalt.err (!%p1705_p4)
}
   0xe   :  { %s1788_s27 = smov 128   ;;  %s1789_s28 = smov 8  }
   0xf   :  { %31 = dma.hbm_to_vmem [thread:$0]  %s1899_s1, 16384, %s26_s25, [#allocation3], %s1788_s27, %s1788_s27, %s1789_s28  }
  0x10   :  { %s1790_s8 = smov [#allocation6]  }
  0x11   :  { %s39_s9 = sshll.u32 %s1790_s8, 4  ;;  %s40_s9 = int_to_ptr.vmem [resolvable:$true] %s39_s9 }
  0x12   :  { %s1717_s10 = scalar_lea.vmem %s40_s9, 9216  ;;  %p1722_p6 = scmp.lt.s32.totalorder %s40_s9, %s40_s9 }
  0x13   :  { %p1718_p5 = scmp.ne.s32.totalorder %s40_s9, %s1717_s10  ;;  %p1723_p7 = scmp.lt.s32.totalorder %s1717_s10, %s1717_s10 }
  0x15   :  { %p1724_p8 = por %p1723_p7, %p1722_p6 }
  0x17   :  { %p1725_p9 = pnand %p1724_p8, %p1718_p5 }
  0x19   :  { %1728 = shalt.err (!%p1725_p9)
}
  0x1a   :  { %s1791_s11 = smov 576   ;;  %s1792_s12 = smov 36  }
  0x1b   :  { %45 = dma.hbm_to_vmem [thread:$0]  %s1901_s3, 9216, %s40_s9, [#allocation7], %s1791_s11, %s1791_s11, %s1792_s12  }
  0x1c   :  { %1777 = dma.done.wait [#allocation3], 16384  }
  0x1d   :  { %1778 = vsyncadd [#allocation3], 4294950912 }
  0x1e   :  { %1779 = dma.done.wait [#allocation7], 9216  }
  0x1f   :  { %1780 = vsyncadd [#allocation7], 4294958080  ;;  %v88_v0 = vld [vmem:[#allocation2 + $0xf8] sm:$0xff]  ;;  %v87_v4 = vld [vmem:[#allocation2 + $0xf0] sm:$0xff]  ;;  %v1793_v30 = vmov 1983009808   ;;  %v198_v32 = vlaneseq }
  0x20   :  { %v120_v1 = vld [vmem:[#allocation2 + $0x1f8] sm:$0xff]  ;;  %1397 = vmatprep.subr.mxu0 %v88_v0  ;;  %v119_v5 = vld [vmem:[#allocation2 + $0x1f0] sm:$0xff]  ;;  %v86_v8 = vld [vmem:[#allocation2 + $0xe8] sm:$0xff]  ;;  %v196_v31 = vunpack.c.l.s4 %v1793_v30  ;;  %vm518_vm0 = vcmask 1041408   ;;  %vm1796_vm1 = vmmov 0   ;;  %s1797_s20 = smov [#allocation11]  }
  0x21   :  { %v72_v2 = vld [vmem:[#allocation2 + $0x78] sm:$0xff]  ;;  %1432 = vmatprep.subr.mxu1 %v120_v1  ;;  %v71_v6 = vld [vmem:[#allocation2 + $0x70] sm:$0xff]  ;;  %v118_v9 = vld [vmem:[#allocation2 + $0x1e8] sm:$0xff]  ;;  %v1846_v42 = vshrl.u32 %v198_v32, 7 }
  0x22   :  { %v104_v3 = vld [vmem:[#allocation2 + $0x178] sm:$0xff]  ;;  %1398 = vmatpush3.msra.mxu0 %v72_v2  ;;  %v103_v7 = vld [vmem:[#allocation2 + $0x170] sm:$0xff]  ;;  %v70_v10 = vld [vmem:[#allocation2 + $0x68] sm:$0xff]  ;;  %v197_v41 = vunpack.c.0.s8 %v196_v31 }
  0x23   :  { %1433 = vmatpush3.msra.mxu1 %v104_v3  ;;  %1399 = vmatprep.subr.mxu0 %v87_v4  ;;  %v102_v11 = vld [vmem:[#allocation2 + $0x168] sm:$0xff]  ;;  %v85_v12 = vld [vmem:[#allocation2 + $0xe0] sm:$0xff]  ;;  %v84_v16 = vld [vmem:[#allocation2 + $0xd8] sm:$0xff] }
  0x24   :  { %1434 = vmatprep.subr.mxu1 %v119_v5  ;;  %1400 = vmatpush3.msra.mxu0 %v71_v6  ;;  %v117_v13 = vld [vmem:[#allocation2 + $0x1e0] sm:$0xff]  ;;  %v116_v17 = vld [vmem:[#allocation2 + $0x1d8] sm:$0xff]  ;;  %v83_v20 = vld [vmem:[#allocation2 + $0xd0] sm:$0xff]  ;;  %v1849_v51 = vsub.s32 %v197_v41, %v1846_v42 }
  0x25   :  { %1435 = vmatpush3.msra.mxu1 %v103_v7  ;;  %1401 = vmatprep.subr.mxu0 %v86_v8  ;;  %v69_v14 = vld [vmem:[#allocation2 + $0x60] sm:$0xff]  ;;  %v68_v18 = vld [vmem:[#allocation2 + $0x58] sm:$0xff]  ;;  %v115_v21 = vld [vmem:[#allocation2 + $0x1d0] sm:$0xff] }
  0x26   :  { %1436 = vmatprep.subr.mxu1 %v118_v9  ;;  %v101_v15 = vld [vmem:[#allocation2 + $0x160] sm:$0xff]  ;;  %1402 = vmatpush3.msra.mxu0 %v70_v10  ;;  %v100_v19 = vld [vmem:[#allocation2 + $0x158] sm:$0xff]  ;;  %v67_v22 = vld [vmem:[#allocation2 + $0x50] sm:$0xff] }
  0x27   :  { %1437 = vmatpush3.msra.mxu1 %v102_v11  ;;  %1403 = vmatprep.subr.mxu0 %v85_v12  ;;  %v99_v23 = vld [vmem:[#allocation2 + $0x150] sm:$0xff]  ;;  %v82_v24 = vld [vmem:[#allocation2 + $0xc8] sm:$0xff]  ;;  %v81_v28 = vld [vmem:[#allocation2 + $0xc0] sm:$0xff] }
  0x28   :  { %1438 = vmatprep.subr.mxu1 %v117_v13  ;;  %1404 = vmatpush3.msra.mxu0 %v69_v14  ;;  %v114_v25 = vld [vmem:[#allocation2 + $0x1c8] sm:$0xff]  ;;  %v113_v29 = vld [vmem:[#allocation2 + $0x1c0] sm:$0xff]  ;;  %v80_v35 = vld [vmem:[#allocation2 + $0xb8] sm:$0xff] }
  0x29   :  { %1439 = vmatpush3.msra.mxu1 %v101_v15  ;;  %1405 = vmatprep.subr.mxu0 %v84_v16  ;;  %v66_v26 = vld [vmem:[#allocation2 + $0x48] sm:$0xff]  ;;  %v65_v33 = vld [vmem:[#allocation2 + $0x40] sm:$0xff]  ;;  %v112_v36 = vld [vmem:[#allocation2 + $0x1b8] sm:$0xff] }
  0x2a   :  { %1440 = vmatprep.subr.mxu1 %v116_v17  ;;  %1406 = vmatpush3.msra.mxu0 %v68_v18  ;;  %v98_v27 = vld [vmem:[#allocation2 + $0x148] sm:$0xff]  ;;  %v97_v34 = vld [vmem:[#allocation2 + $0x140] sm:$0xff]  ;;  %v64_v37 = vld [vmem:[#allocation2 + $0x38] sm:$0xff] }
  0x2b   :  { %1441 = vmatpush3.msra.mxu1 %v100_v19  ;;  %1407 = vmatprep.subr.mxu0 %v83_v20  ;;  %v96_v38 = vld [vmem:[#allocation2 + $0x138] sm:$0xff]  ;;  %v79_v39 = vld [vmem:[#allocation2 + $0xb0] sm:$0xff]  ;;  %v78_v45 = vld [vmem:[#allocation2 + $0xa8] sm:$0xff] }
  0x2c   :  { %1442 = vmatprep.subr.mxu1 %v115_v21  ;;  %1408 = vmatpush3.msra.mxu0 %v67_v22  ;;  %v111_v40 = vld [vmem:[#allocation2 + $0x1b0] sm:$0xff]  ;;  %v110_v46 = vld [vmem:[#allocation2 + $0x1a8] sm:$0xff]  ;;  %v77_v49 = vld [vmem:[#allocation2 + $0xa0] sm:$0xff] }
  0x2d   :  { %1443 = vmatpush3.msra.mxu1 %v99_v23  ;;  %1409 = vmatprep.subr.mxu0 %v82_v24  ;;  %v63_v43 = vld [vmem:[#allocation2 + $0x30] sm:$0xff]  ;;  %v62_v47 = vld [vmem:[#allocation2 + $0x28] sm:$0xff]  ;;  %v109_v50 = vld [vmem:[#allocation2 + $0x1a0] sm:$0xff] }
  0x2e   :  { %1444 = vmatprep.subr.mxu1 %v114_v25  ;;  %1410 = vmatpush3.msra.mxu0 %v66_v26  ;;  %v95_v44 = vld [vmem:[#allocation2 + $0x130] sm:$0xff]  ;;  %v94_v48 = vld [vmem:[#allocation2 + $0x128] sm:$0xff]  ;;  %v61_v52 = vld [vmem:[#allocation2 + $0x20] sm:$0xff] }
  0x2f   :  { %1445 = vmatpush3.msra.mxu1 %v98_v27  ;;  %1411 = vmatprep.subr.mxu0 %v81_v28  ;;  %v93_v53 = vld [vmem:[#allocation2 + $0x120] sm:$0xff]  ;;  %v76_v55 = vld [vmem:[#allocation2 + $0x98] sm:$0xff]  ;;  %v75_v60 = vld [vmem:[#allocation2 + $0x90] sm:$0xff] }
  0x30   :  { %1446 = vmatprep.subr.mxu1 %v113_v29  ;;  %1412 = vmatpush3.msra.mxu0 %v65_v33  ;;  %v55_v54 = vld [vmem:[%s1898_s0] sm:$0xff]  ;;  %v108_v56 = vld [vmem:[#allocation2 + $0x198] sm:$0xff]  ;;  %v107_v61 = vld [vmem:[#allocation2 + $0x190] sm:$0xff] }
  0x31   :  { %1447 = vmatpush3.msra.mxu1 %v97_v34  ;;  %1413 = vmatprep.subr.mxu0 %v80_v35  ;;  %v194_v57 = vcombine.high %v55_v54, %v55_v54  ;;  %v60_v58 = vld [vmem:[#allocation2 + $0x18] sm:$0xff]  ;;  %v201_v62 = vrot.slane %v55_v54, %v1849_v51  ;;  %v59_v63 = vld [vmem:[#allocation2 + $0x10] sm:$0xff]  ;;  %v74_v1 = vld [vmem:[#allocation2 + $0x88] sm:$0xff] }
  0x32   :  { %1448 = vmatprep.subr.mxu1 %v112_v36  ;;  %1414 = vmatpush3.msra.mxu0 %v64_v37  ;;  %v92_v59 = vld [vmem:[#allocation2 + $0x118] sm:$0xff]  ;;  %v91_v0 = vld [vmem:[#allocation2 + $0x110] sm:$0xff]  ;;  %v106_v2 = vld [vmem:[#allocation2 + $0x188] sm:$0xff] }
  0x33   :  { %1449 = vmatpush3.msra.mxu1 %v96_v38  ;;  %1415 = vmatprep.subr.mxu0 %v79_v39  ;;  %v208_v3 = vrot.slane %v194_v57, %v1849_v51  ;;  %v58_v4 = vld [vmem:[#allocation2 + $0x8] sm:$0xff]  ;;  %v73_v6 = vld [vmem:[#allocation2 + $0x80] sm:$0xff]  ;;  %v209_v8 = vcombine.high %v201_v62, %v201_v62  ;;  %v152_v12 = vld [vmem:[#allocation2 + $0x2f8] sm:$0xff] }
  0x34   :  { %1450 = vmatprep.subr.mxu1 %v111_v40  ;;  %1416 = vmatpush3.msra.mxu0 %v63_v43  ;;  %v90_v5 = vld [vmem:[#allocation2 + $0x108] sm:$0xff]  ;;  %v105_v7 = vld [vmem:[#allocation2 + $0x180] sm:$0xff]  ;;  %v184_v13 = vld [vmem:[#allocation2 + $0x3f8] sm:$0xff] }
  0x35   :  { %1451 = vmatpush3.msra.mxu1 %v95_v44  ;;  %1417 = vmatprep.subr.mxu0 %v78_v45  ;;  %v57_v9 = vld [vmem:[#allocation2] sm:$0xff]  ;;  %v210_v11 = vcombine.high %v208_v3, %v208_v3  ;;  %v136_v14 = vld [vmem:[#allocation2 + $0x278] sm:$0xff]  ;;  %v151_v16 = vld [vmem:[#allocation2 + $0x2f0] sm:$0xff] }
  0x36   :  { %1452 = vmatprep.subr.mxu1 %v110_v46  ;;  %1418 = vmatpush3.msra.mxu0 %v62_v47  ;;  %v89_v10 = vld [vmem:[#allocation2 + $0x100] sm:$0xff]  ;;  %v168_v15 = vld [vmem:[#allocation2 + $0x378] sm:$0xff]  ;;  %v183_v17 = vld [vmem:[#allocation2 + $0x3f0] sm:$0xff] }
  0x37   :  { %1453 = vmatpush3.msra.mxu1 %v94_v48  ;;  %1419 = vmatprep.subr.mxu0 %v77_v49  ;;  %v135_v18 = vld [vmem:[#allocation2 + $0x270] sm:$0xff]  ;;  %v150_v20 = vld [vmem:[#allocation2 + $0x2e8] sm:$0xff]  ;;  %v149_v24 = vld [vmem:[#allocation2 + $0x2e0] sm:$0xff] }
  0x38   :  { %1454 = vmatprep.subr.mxu1 %v109_v50  ;;  %1420 = vmatpush3.msra.mxu0 %v61_v52  ;;  %v167_v19 = vld [vmem:[#allocation2 + $0x370] sm:$0xff]  ;;  %v182_v21 = vld [vmem:[#allocation2 + $0x3e8] sm:$0xff]  ;;  %v181_v25 = vld [vmem:[#allocation2 + $0x3e0] sm:$0xff] }
  0x39   :  { %1455 = vmatpush3.msra.mxu1 %v93_v53  ;;  %1421 = vmatprep.subr.mxu0 %v76_v55  ;;  %v134_v22 = vld [vmem:[#allocation2 + $0x268] sm:$0xff]  ;;  %v133_v26 = vld [vmem:[#allocation2 + $0x260] sm:$0xff]  ;;  %v148_v28 = vld [vmem:[#allocation2 + $0x2d8] sm:$0xff] }
  0x3a   :  { %1456 = vmatprep.subr.mxu1 %v108_v56  ;;  %1422 = vmatpush3.msra.mxu0 %v60_v58  ;;  %v166_v23 = vld [vmem:[#allocation2 + $0x368] sm:$0xff]  ;;  %v165_v27 = vld [vmem:[#allocation2 + $0x360] sm:$0xff]  ;;  %v180_v29 = vld [vmem:[#allocation2 + $0x3d8] sm:$0xff] }
  0x3b   :  { %1457 = vmatpush3.msra.mxu1 %v92_v59  ;;  %1423 = vmatprep.subr.mxu0 %v75_v60  ;;  %v132_v30 = vld [vmem:[#allocation2 + $0x258] sm:$0xff]  ;;  %v147_v32 = vld [vmem:[#allocation2 + $0x2d0] sm:$0xff]  ;;  %v146_v36 = vld [vmem:[#allocation2 + $0x2c8] sm:$0xff] }
  0x3c   :  { %1458 = vmatprep.subr.mxu1 %v107_v61  ;;  %1424 = vmatpush3.msra.mxu0 %v59_v63  ;;  %v164_v31 = vld [vmem:[#allocation2 + $0x358] sm:$0xff]  ;;  %v179_v33 = vld [vmem:[#allocation2 + $0x3d0] sm:$0xff]  ;;  %v178_v37 = vld [vmem:[#allocation2 + $0x3c8] sm:$0xff] }
  0x3d   :  { %1459 = vmatpush3.msra.mxu1 %v91_v0  ;;  %1425 = vmatprep.subr.mxu0 %v74_v1  ;;  %v131_v34 = vld [vmem:[#allocation2 + $0x250] sm:$0xff]  ;;  %v130_v38 = vld [vmem:[#allocation2 + $0x248] sm:$0xff]  ;;  %v145_v40 = vld [vmem:[#allocation2 + $0x2c0] sm:$0xff] }
  0x3e   :  { %1460 = vmatprep.subr.mxu1 %v106_v2  ;;  %1426 = vmatpush3.msra.mxu0 %v58_v4  ;;  %v163_v35 = vld [vmem:[#allocation2 + $0x350] sm:$0xff]  ;;  %v162_v39 = vld [vmem:[#allocation2 + $0x348] sm:$0xff]  ;;  %v177_v41 = vld [vmem:[#allocation2 + $0x3c0] sm:$0xff] }
  0x3f   :  { %1461 = vmatpush3.msra.mxu1 %v90_v5  ;;  %1427 = vmatprep.subr.mxu0 %v73_v6  ;;  %v129_v43 = vld [vmem:[#allocation2 + $0x240] sm:$0xff]  ;;  %v144_v45 = vld [vmem:[#allocation2 + $0x2b8] sm:$0xff]  ;;  %v143_v49 = vld [vmem:[#allocation2 + $0x2b0] sm:$0xff] }
  0x40   :  { %1462 = vmatprep.subr.mxu1 %v105_v7  ;;  %1428 = vmatpush3.msra.mxu0 %v57_v9  ;;  %v161_v44 = vld [vmem:[#allocation2 + $0x340] sm:$0xff]  ;;  %v176_v46 = vld [vmem:[#allocation2 + $0x3b8] sm:$0xff]  ;;  %v175_v50 = vld [vmem:[#allocation2 + $0x3b0] sm:$0xff] }
  0x41   :  { %300 = vmatprep.mubr.f32.mxu0 %v209_v8  ;;  %1463 = vmatpush3.msra.mxu1 %v89_v10  ;;  %v128_v47 = vld [vmem:[#allocation2 + $0x238] sm:$0xff]  ;;  %v127_v52 = vld [vmem:[#allocation2 + $0x230] sm:$0xff]  ;;  %v142_v54 = vld [vmem:[#allocation2 + $0x2a8] sm:$0xff] }
  0x42   :  { %301 = vmatmul.mubr.f32.vlgmr.msra.gmra.mxu0 %v201_v62  ;;  %370 = vmatprep.mubr.f32.mxu1 %v210_v11  ;;  %v160_v48 = vld [vmem:[#allocation2 + $0x338] sm:$0xff]  ;;  %v159_v53 = vld [vmem:[#allocation2 + $0x330] sm:$0xff]  ;;  %v174_v55 = vld [vmem:[#allocation2 + $0x3a8] sm:$0xff] }
  0x43   :  { %1467 = vmatprep.subr.mxu0 %v152_v12  ;;  %1502 = vmatprep.subr.mxu1 %v184_v13  ;;  %v56_v56 = vld [vmem:[%s1898_s0 + $0x8] sm:$0xff]  ;;  %v141_v59 = vld [vmem:[#allocation2 + $0x2a0] sm:$0xff]  ;;  %v140_v63 = vld [vmem:[#allocation2 + $0x298] sm:$0xff] }
  0x44   :  { %371 = vmatmul.mubr.f32.vlgmr.msra.gmra.mxu1 %v208_v3  ;;  %1468 = vmatpush3.msra.mxu0 %v136_v14  ;;  %v126_v57 = vld [vmem:[#allocation2 + $0x228] sm:$0xff]  ;;  %v173_v60 = vld [vmem:[#allocation2 + $0x3a0] sm:$0xff]  ;;  %v172_v0 = vld [vmem:[#allocation2 + $0x398] sm:$0xff]  ;;  %v211_v3 = vcombine.high %v56_v56, %v56_v56  ;;  %v218_v10 = vrot.slane %v56_v56, %v1849_v51  ;;  %v1794_v56 = vmov 0  }
  0x45   :  { %1503 = vmatpush3.msra.mxu1 %v168_v15  ;;  %1469 = vmatprep.subr.mxu0 %v151_v16  ;;  %v158_v58 = vld [vmem:[#allocation2 + $0x328] sm:$0xff]  ;;  %v125_v61 = vld [vmem:[#allocation2 + $0x220] sm:$0xff]  ;;  %v124_v1 = vld [vmem:[#allocation2 + $0x218] sm:$0xff] }
  0x46   :  { %1504 = vmatprep.subr.mxu1 %v183_v17  ;;  %1470 = vmatpush3.msra.mxu0 %v135_v18  ;;  %v157_v62 = vld [vmem:[#allocation2 + $0x320] sm:$0xff]  ;;  %v156_v2 = vld [vmem:[#allocation2 + $0x318] sm:$0xff]  ;;  %v139_v4 = vld [vmem:[#allocation2 + $0x290] sm:$0xff]  ;;  %v225_v13 = vrot.slane %v211_v3, %v1849_v51  ;;  %v226_v17 = vcombine.high %v218_v10, %v218_v10 }
  0x47   :  { %1505 = vmatpush3.msra.mxu1 %v167_v19  ;;  %1471 = vmatprep.subr.mxu0 %v150_v20  ;;  %v171_v5 = vld [vmem:[#allocation2 + $0x390] sm:$0xff]  ;;  %v138_v8 = vld [vmem:[#allocation2 + $0x288] sm:$0xff]  ;;  %v137_v14 = vld [vmem:[#allocation2 + $0x280] sm:$0xff] }
  0x48   :  { %1506 = vmatprep.subr.mxu1 %v182_v21  ;;  %1472 = vmatpush3.msra.mxu0 %v134_v22  ;;  %v123_v6 = vld [vmem:[#allocation2 + $0x210] sm:$0xff]  ;;  %v170_v9 = vld [vmem:[#allocation2 + $0x388] sm:$0xff]  ;;  %v169_v15 = vld [vmem:[#allocation2 + $0x380] sm:$0xff]  ;;  %v227_v19 = vcombine.high %v225_v13, %v225_v13 }
  0x49   :  { %1507 = vmatpush3.msra.mxu1 %v166_v23  ;;  %1473 = vmatprep.subr.mxu0 %v149_v24  ;;  %v155_v7 = vld [vmem:[#allocation2 + $0x310] sm:$0xff]  ;;  %v122_v11 = vld [vmem:[#allocation2 + $0x208] sm:$0xff]  ;;  %v121_v16 = vld [vmem:[#allocation2 + $0x200] sm:$0xff] }
  0x4a   :  { %1508 = vmatprep.subr.mxu1 %v181_v25  ;;  %1474 = vmatpush3.msra.mxu0 %v133_v26  ;;  %v154_v12 = vld [vmem:[#allocation2 + $0x308] sm:$0xff]  ;;  %v153_v18 = vld [vmem:[#allocation2 + $0x300] sm:$0xff]  ;;  %v1583_v20 = vld [vmem:[#allocation6 + $0x1f8] ss:$36 sps:$4 sm:$0xff]  }
  0x4b   :  { %1509 = vmatpush3.msra.mxu1 %v165_v27  ;;  %1475 = vmatprep.subr.mxu0 %v148_v28  ;;  %v1585_v21 = vld [vmem:[#allocation6 + $0x1fc] ss:$36 sps:$4 sm:$0xff]   ;;  %v1588_v23 = vld [vmem:[#allocation6 + $0x204] ss:$36 sps:$4 sm:$0xff]   ;;  %v1591_v24 = vld [vmem:[#allocation6 + $0x1b4] ss:$36 sps:$4 sm:$0xff]  }
  0x4c   :  { %1510 = vmatprep.subr.mxu1 %v180_v29  ;;  %1476 = vmatpush3.msra.mxu0 %v132_v30  ;;  %v1586_v22 = vld [vmem:[#allocation6 + $0x200] ss:$36 sps:$4 sm:$0xff]   ;;  %v1589_v26 = vld [vmem:[#allocation6 + $0x1b0] ss:$36 sps:$4 sm:$0xff]   ;;  %v1592_v27 = vld [vmem:[#allocation6 + $0x1b8] ss:$36 sps:$4 sm:$0xff]  }
  0x4d   :  { %1511 = vmatpush3.msra.mxu1 %v164_v31  ;;  %1477 = vmatprep.subr.mxu0 %v147_v32  ;;  %v1594_v25 = vld [vmem:[#allocation6 + $0x1bc] ss:$36 sps:$4 sm:$0xff]   ;;  %v1597_v28 = vld [vmem:[#allocation6 + $0x16c] ss:$36 sps:$4 sm:$0xff]   ;;  %v1600_v29 = vld [vmem:[#allocation6 + $0x174] ss:$36 sps:$4 sm:$0xff]  }
  0x4e   :  { %1512 = vmatprep.subr.mxu1 %v179_v33  ;;  %1478 = vmatpush3.msra.mxu0 %v131_v34  ;;  %v1595_v30 = vld [vmem:[#allocation6 + $0x168] ss:$36 sps:$4 sm:$0xff]   ;;  %v1598_v31 = vld [vmem:[#allocation6 + $0x170] ss:$36 sps:$4 sm:$0xff]   ;;  %v1601_v34 = vld [vmem:[#allocation6 + $0x120] ss:$36 sps:$4 sm:$0xff]  }
  0x4f   :  { %1513 = vmatpush3.msra.mxu1 %v163_v35  ;;  %1479 = vmatprep.subr.mxu0 %v146_v36  ;;  %v1603_v32 = vld [vmem:[#allocation6 + $0x124] ss:$36 sps:$4 sm:$0xff]   ;;  %v1606_v33 = vld [vmem:[#allocation6 + $0x12c] ss:$36 sps:$4 sm:$0xff]   ;;  %v1609_v36 = vld [vmem:[#allocation6 + $0xdc] ss:$36 sps:$4 sm:$0xff]  }
  0x50   :  { %1514 = vmatprep.subr.mxu1 %v178_v37  ;;  %1480 = vmatpush3.msra.mxu0 %v130_v38  ;;  %v1604_v35 = vld [vmem:[#allocation6 + $0x128] ss:$36 sps:$4 sm:$0xff]   ;;  %v1607_v38 = vld [vmem:[#allocation6 + $0xd8] ss:$36 sps:$4 sm:$0xff]  }
  0x51   :  { %1515 = vmatpush3.msra.mxu1 %v162_v39  ;;  %1481 = vmatprep.subr.mxu0 %v145_v40  ;;  %v1612_v37 = vld [vmem:[#allocation6 + $0xe4] ss:$36 sps:$4 sm:$0xff]   ;;  %v1615_v40 = vld [vmem:[#allocation6 + $0x94] ss:$36 sps:$4 sm:$0xff]  }
  0x52   :  { %1516 = vmatprep.subr.mxu1 %v177_v41  ;;  %1482 = vmatpush3.msra.mxu0 %v129_v43  ;;  %v1610_v39 = vld [vmem:[#allocation6 + $0xe0] ss:$36 sps:$4 sm:$0xff]   ;;  %v1613_v43 = vld [vmem:[#allocation6 + $0x90] ss:$36 sps:$4 sm:$0xff]  }
  0x53   :  { %1517 = vmatpush3.msra.mxu1 %v161_v44  ;;  %1483 = vmatprep.subr.mxu0 %v144_v45  ;;  %v1618_v41 = vld [vmem:[#allocation6 + $0x9c] ss:$36 sps:$4 sm:$0xff]   ;;  %v1621_v45 = vld [vmem:[#allocation6 + $0x4c] ss:$36 sps:$4 sm:$0xff]  }
  0x54   :  { %1518 = vmatprep.subr.mxu1 %v176_v46  ;;  %1484 = vmatpush3.msra.mxu0 %v128_v47  ;;  %v1616_v44 = vld [vmem:[#allocation6 + $0x98] ss:$36 sps:$4 sm:$0xff]   ;;  %v1619_v47 = vld [vmem:[#allocation6 + $0x48] ss:$36 sps:$4 sm:$0xff]  }
  0x55   :  { %1519 = vmatpush3.msra.mxu1 %v160_v48  ;;  %1485 = vmatprep.subr.mxu0 %v143_v49  ;;  %v1624_v46 = vld [vmem:[#allocation6 + $0x54] ss:$36 sps:$4 sm:$0xff]   ;;  %v1627_v49 = vld [vmem:[#allocation6 + $0x4] ss:$36 sps:$4 sm:$0xff]  }
  0x56   :  { %1520 = vmatprep.subr.mxu1 %v175_v50  ;;  %1486 = vmatpush3.msra.mxu0 %v127_v52  ;;  %v1622_v48 = vld [vmem:[#allocation6 + $0x50] ss:$36 sps:$4 sm:$0xff]   ;;  %v1625_v52 = vld [vmem:[#allocation6] ss:$36 sps:$4 sm:$0xff]  }
  0x57   :  { %1521 = vmatpush3.msra.mxu1 %v159_v53  ;;  %1487 = vmatprep.subr.mxu0 %v142_v54  ;;  %v1630_v50 = vld [vmem:[#allocation6 + $0xc] ss:$36 sps:$4 sm:$0xff]  }
  0x58   :  { %1522 = vmatprep.subr.mxu1 %v174_v55  ;;  %1488 = vmatpush3.msra.mxu0 %v126_v57  ;;  %v1628_v53 = vld [vmem:[#allocation6 + $0x8] ss:$36 sps:$4 sm:$0xff]   ;;  %v1636_v55 = vld [vmem:[#allocation6 + $0x214] ss:$36 sps:$4 sm:$0xff]  }
  0x59   :  { %1523 = vmatpush3.msra.mxu1 %v158_v58  ;;  %1489 = vmatprep.subr.mxu0 %v141_v59  ;;  %v1633_v54 = vld [vmem:[#allocation6 + $0x20c] ss:$36 sps:$4 sm:$0xff]  }
  0x5a   :  { %1524 = vmatprep.subr.mxu1 %v173_v60  ;;  %1490 = vmatpush3.msra.mxu0 %v125_v61  ;;  %v1323_v61 = vld [vmem:[%s1900_s2] ss:$0 sm:$0xff] }
  0x5b   :  { %1525 = vmatpush3.msra.mxu1 %v157_v62  ;;  %1491 = vmatprep.subr.mxu0 %v140_v63 }
  0x5c   :  { %1526 = vmatprep.subr.mxu1 %v172_v0  ;;  %1492 = vmatpush3.msra.mxu0 %v124_v1 }
  0x5d   :  { %1527 = vmatpush3.msra.mxu1 %v156_v2  ;;  %1493 = vmatprep.subr.mxu0 %v139_v4 }
  0x5e   :  { %1528 = vmatprep.subr.mxu1 %v171_v5  ;;  %1494 = vmatpush3.msra.mxu0 %v123_v6 }
  0x5f   :  { %1529 = vmatpush3.msra.mxu1 %v155_v7  ;;  %1495 = vmatprep.subr.mxu0 %v138_v8 }
  0x60   :  { %1530 = vmatprep.subr.mxu1 %v170_v9  ;;  %1496 = vmatpush3.msra.mxu0 %v122_v11 }
  0x61   :  { %1531 = vmatpush3.msra.mxu1 %v154_v12  ;;  %1497 = vmatprep.subr.mxu0 %v137_v14  ;;  %v1634_v14 = vld [vmem:[#allocation6 + $0x210] ss:$36 sps:$4 sm:$0xff]  }
  0x62   :  { %1532 = vmatprep.subr.mxu1 %v169_v15  ;;  %1498 = vmatpush3.msra.mxu0 %v121_v16  ;;  %v1639_v16 = vld [vmem:[#allocation6 + $0x1c4] ss:$36 sps:$4 sm:$0xff]  }
  0x63   :  { %440 = vmatprep.mubr.f32.mxu0 %v226_v17  ;;  %1533 = vmatpush3.msra.mxu1 %v153_v18  ;;  %v1642_v17 = vld [vmem:[#allocation6 + $0x1cc] ss:$36 sps:$4 sm:$0xff]   ;;  %v1637_v18 = vld [vmem:[#allocation6 + $0x1c0] ss:$36 sps:$4 sm:$0xff]  }
  0x64   :  { %510 = vmatprep.mubr.f32.mxu1 %v227_v19  ;;  %441 = vmatmul.mubr.f32.vlgmr.msra.gmra.mxu0 %v218_v10  ;;  %v1640_v19 = vld [vmem:[#allocation6 + $0x1c8] ss:$36 sps:$4 sm:$0xff]  }
  0x65   :  { %511 = vmatmul.mubr.f32.vlgmr.msra.gmra.mxu1 %v225_v13  ;;  %1029 = vmatprep.subr.bf16.mxu0 %v1585_v21  ;;  %v1631_v13 = vld [vmem:[#allocation6 + $0x208] ss:$36 sps:$4 sm:$0xff]  }
  0x66   :  { %1070 = vmatprep.subr.bf16.mxu1 %v1588_v23  ;;  %1030 = vmatpush1.bf16.msra.mxu0 %v1583_v20  ;;  %v1645_v20 = vld [vmem:[#allocation6 + $0x17c] ss:$36 sps:$4 sm:$0xff]   ;;  %v1648_v21 = vld [vmem:[#allocation6 + $0x184] ss:$36 sps:$4 sm:$0xff]  }
  0x67   :  { %1071 = vmatpush1.bf16.msra.mxu1 %v1586_v22  ;;  %1031 = vmatprep.subr.bf16.mxu0 %v1591_v24  ;;  %v1643_v22 = vld [vmem:[#allocation6 + $0x178] ss:$36 sps:$4 sm:$0xff]   ;;  %v1646_v23 = vld [vmem:[#allocation6 + $0x180] ss:$36 sps:$4 sm:$0xff]  }
  0x68   :  { %1072 = vmatprep.subr.bf16.mxu1 %v1594_v25  ;;  %1061 = vmatprep.mubr.bf16.mxu0 %v1794_v56  ;;  %v1651_v24 = vld [vmem:[#allocation6 + $0x134] ss:$36 sps:$4 sm:$0xff]   ;;  %v1654_v25 = vld [vmem:[#allocation6 + $0x13c] ss:$36 sps:$4 sm:$0xff]  }
  0x69   :  { %1102 = vmatprep.mubr.bf16.mxu1 %v1794_v56 }
  0x6a   :  { %1032 = vmatpush1.bf16.msra.mxu0 %v1589_v26  ;;  %v1649_v26 = vld [vmem:[#allocation6 + $0x130] ss:$36 sps:$4 sm:$0xff]  }
  0x6b   :  { %1073 = vmatpush1.bf16.msra.mxu1 %v1592_v27  ;;  %1033 = vmatprep.subr.bf16.mxu0 %v1597_v28  ;;  %v1652_v27 = vld [vmem:[#allocation6 + $0x138] ss:$36 sps:$4 sm:$0xff]   ;;  %v1657_v28 = vld [vmem:[#allocation6 + $0xec] ss:$36 sps:$4 sm:$0xff]  }
  0x6c   :  { %1074 = vmatprep.subr.bf16.mxu1 %v1600_v29  ;;  %v1660_v29 = vld [vmem:[#allocation6 + $0xf4] ss:$36 sps:$4 sm:$0xff]  }
  0x6e   :  { %1034 = vmatpush1.bf16.msra.mxu0 %v1595_v30  ;;  %v1655_v30 = vld [vmem:[#allocation6 + $0xe8] ss:$36 sps:$4 sm:$0xff]  }
  0x6f   :  { %1075 = vmatpush1.bf16.msra.mxu1 %v1598_v31  ;;  %1035 = vmatprep.subr.bf16.mxu0 %v1603_v32  ;;  %v1658_v31 = vld [vmem:[#allocation6 + $0xf0] ss:$36 sps:$4 sm:$0xff]   ;;  %v1663_v32 = vld [vmem:[#allocation6 + $0xa4] ss:$36 sps:$4 sm:$0xff]  }
  0x70   :  { %1076 = vmatprep.subr.bf16.mxu1 %v1606_v33  ;;  %v1666_v33 = vld [vmem:[#allocation6 + $0xac] ss:$36 sps:$4 sm:$0xff]  }
  0x72   :  { %1036 = vmatpush1.bf16.msra.mxu0 %v1601_v34  ;;  %v1661_v34 = vld [vmem:[#allocation6 + $0xa0] ss:$36 sps:$4 sm:$0xff]  }
  0x73   :  { %1077 = vmatpush1.bf16.msra.mxu1 %v1604_v35  ;;  %1037 = vmatprep.subr.bf16.mxu0 %v1609_v36  ;;  %v1664_v35 = vld [vmem:[#allocation6 + $0xa8] ss:$36 sps:$4 sm:$0xff]   ;;  %v1669_v36 = vld [vmem:[#allocation6 + $0x5c] ss:$36 sps:$4 sm:$0xff]  }
  0x74   :  { %1078 = vmatprep.subr.bf16.mxu1 %v1612_v37  ;;  %v1672_v37 = vld [vmem:[#allocation6 + $0x64] ss:$36 sps:$4 sm:$0xff]  }
  0x76   :  { %1038 = vmatpush1.bf16.msra.mxu0 %v1607_v38  ;;  %v1667_v38 = vld [vmem:[#allocation6 + $0x58] ss:$36 sps:$4 sm:$0xff]  }
  0x77   :  { %1079 = vmatpush1.bf16.msra.mxu1 %v1610_v39  ;;  %1039 = vmatprep.subr.bf16.mxu0 %v1615_v40  ;;  %v1670_v39 = vld [vmem:[#allocation6 + $0x60] ss:$36 sps:$4 sm:$0xff]   ;;  %v1675_v40 = vld [vmem:[#allocation6 + $0x14] ss:$36 sps:$4 sm:$0xff]  }
  0x78   :  { %1080 = vmatprep.subr.bf16.mxu1 %v1618_v41  ;;  %v1678_v41 = vld [vmem:[#allocation6 + $0x1c] ss:$36 sps:$4 sm:$0xff]  }
  0x7a   :  { %1040 = vmatpush1.bf16.msra.mxu0 %v1613_v43  ;;  %v1673_v43 = vld [vmem:[#allocation6 + $0x10] ss:$36 sps:$4 sm:$0xff]  }
  0x7b   :  { %1081 = vmatpush1.bf16.msra.mxu1 %v1616_v44  ;;  %1041 = vmatprep.subr.bf16.mxu0 %v1621_v45  ;;  %v1676_v44 = vld [vmem:[#allocation6 + $0x18] ss:$36 sps:$4 sm:$0xff]  }
  0x7c   :  { %1082 = vmatprep.subr.bf16.mxu1 %v1624_v46  ;;  %v1679_v45 = vld [vmem:[#allocation6 + $0x218] ss:$36 sps:$4 sm:$0xff]   ;;  %v1795_v46 = vmov 0.0  }
  0x7e   :  { %1042 = vmatpush1.bf16.msra.mxu0 %v1619_v47  ;;  %v1680_v47 = vld [vmem:[#allocation6 + $0x1d0] ss:$36 sps:$4 sm:$0xff]  }
  0x7f   :  { %1083 = vmatpush1.bf16.msra.mxu1 %v1622_v48  ;;  %1043 = vmatprep.subr.bf16.mxu0 %v1627_v49  ;;  %v1681_v48 = vld [vmem:[#allocation6 + $0x188] ss:$36 sps:$4 sm:$0xff]   ;;  %v1682_v49 = vld [vmem:[#allocation6 + $0x140] ss:$36 sps:$4 sm:$0xff]  }
  0x80   :  { %1084 = vmatprep.subr.bf16.mxu1 %v1630_v50  ;;  %v1683_v50 = vld [vmem:[#allocation6 + $0xf8] ss:$36 sps:$4 sm:$0xff]  }
  0x82   :  { %1044 = vmatpush1.bf16.msra.mxu0 %v1625_v52  ;;  %v1684_v52 = vld [vmem:[#allocation6 + $0xb0] ss:$36 sps:$4 sm:$0xff]  }
  0x83   :  { %1085 = vmatpush1.bf16.msra.mxu1 %v1628_v53  ;;  %1111 = vmatprep.subr.bf16.mxu0 %v1633_v54  ;;  %v1685_v53 = vld [vmem:[#allocation6 + $0x68] ss:$36 sps:$4 sm:$0xff]   ;;  %v1686_v54 = vld [vmem:[#allocation6 + $0x20] ss:$36 sps:$4 sm:$0xff]  }
  0x84   :  { %1152 = vmatprep.subr.bf16.mxu1 %v1636_v55 }
 0x102   :  { %v1429_v57 = vpop.f32.mrf.mxu0 }
 0x104   :  { %v1464_v58 = vpop.f32.mrf.mxu1  ;;  %v1430_v59 = vpop.f32.mrf.mxu0 }
 0x105   :  { %v1431_v60 = vadd.f32 %v1430_v59, %v1429_v57 }
 0x106   :  { %v1465_v62 = vpop.f32.mrf.mxu1 }
 0x107   :  { %v303_v63 = vadd.f32 %v1431_v60, %v1323_v61  ;;  %v1466_v0 = vadd.f32 %v1465_v62, %v1464_v58  ;;  %v618_v62 = vsub.s32 0, %v1846_v42 }
 0x109   :  { %v373_v5 = vadd.f32 %v1466_v0, %v303_v63  ;;  %v626_v63 = vsub.s32 2, %v1846_v42  ;;  %v622_v0 = vsub.s32 1, %v1846_v42 }
 0x124   :  { %v1499_v1 = vpop.f32.mrf.mxu0 }
 0x125   :  { %v1534_v2 = vpop.f32.mrf.mxu1 }
 0x126   :  { %v1500_v3 = vpop.f32.mrf.mxu0 }
 0x127   :  { %v1535_v4 = vpop.f32.mrf.mxu1  ;;  %v1501_v6 = vadd.f32 %v1500_v3, %v1499_v1  ;;  %v630_v1 = vsub.s32 3, %v1846_v42 }
 0x128   :  { %v1536_v8 = vadd.f32 %v1535_v4, %v1534_v2  ;;  %v612_v2 = vld [vmem:[%s1902_s4] sm:$0xff] }
 0x129   :  { %v443_v7 = vadd.f32 %v1501_v6, %v373_v5  ;;  %v619_v3 = vrot.slane %v612_v2, %v618_v62  ;;  %v627_v4 = vrot.slane %v612_v2, %v626_v63  ;;  %v623_v5 = vrot.slane %v612_v2, %v622_v0 }
 0x12a   :  { %v631_v6 = vrot.slane %v612_v2, %v630_v1 }
 0x12b   :  { %v513_v9 = vadd.f32 %v1536_v8, %v443_v7 }
 0x12d   :  { %1687 = vtanh.f32 %v513_v9  ;;  %v517_v10 = vmul.f32 %v513_v9, %v513_v9 }
 0x12f   :  { %v519_v11 = vsel %vm518_vm0, %v517_v10, 0.0 }
 0x130   :  { %520 = vadd.xlane.f32.xlu0 %v519_v11 }
 0x13a   :  { %v1688_v12 = vpop.eup %1687 }
 0x13b   :  { %v1864_v15 = vpack.c.bf16 %v1688_v12, %v1688_v12 }
 0x13d   :  { %1062 = vmatmul.mubr.bf16.vlgmr.msra.gmra.mxu0 %v1864_v15  ;;  %1103 = vmatmul.mubr.bf16.vlgmr.msra.gmra.mxu1 %v1864_v15 }
 0x13e   :  { %1112 = vmatpush1.bf16.msra.mxu0 %v1631_v13  ;;  %1153 = vmatpush1.bf16.msra.mxu1 %v1634_v14 }
 0x13f   :  { %1113 = vmatprep.subr.bf16.mxu0 %v1639_v16  ;;  %1154 = vmatprep.subr.bf16.mxu1 %v1642_v17 }
 0x140   :  { %1143 = vmatprep.mubr.bf16.mxu0 %v1794_v56  ;;  %1184 = vmatprep.mubr.bf16.mxu1 %v1794_v56 }
 0x142   :  { %1114 = vmatpush1.bf16.msra.mxu0 %v1637_v18  ;;  %1155 = vmatpush1.bf16.msra.mxu1 %v1640_v19 }
 0x143   :  { %1115 = vmatprep.subr.bf16.mxu0 %v1645_v20  ;;  %1156 = vmatprep.subr.bf16.mxu1 %v1648_v21 }
 0x146   :  { %1116 = vmatpush1.bf16.msra.mxu0 %v1643_v22  ;;  %1157 = vmatpush1.bf16.msra.mxu1 %v1646_v23 }
 0x147   :  { %1117 = vmatprep.subr.bf16.mxu0 %v1651_v24  ;;  %1158 = vmatprep.subr.bf16.mxu1 %v1654_v25  ;;  %v634_v24 = vsub.s32 4, %v1846_v42  ;;  %v642_v25 = vsub.s32 6, %v1846_v42 }
 0x14a   :  { %1118 = vmatpush1.bf16.msra.mxu0 %v1649_v26  ;;  %1159 = vmatpush1.bf16.msra.mxu1 %v1652_v27  ;;  %v638_v26 = vsub.s32 5, %v1846_v42  ;;  %v646_v27 = vsub.s32 7, %v1846_v42 }
 0x14b   :  { %1119 = vmatprep.subr.bf16.mxu0 %v1657_v28  ;;  %1160 = vmatprep.subr.bf16.mxu1 %v1660_v29  ;;  %v635_v28 = vrot.slane %v612_v2, %v634_v24  ;;  %v643_v29 = vrot.slane %v612_v2, %v642_v25 }
 0x14e   :  { %1120 = vmatpush1.bf16.msra.mxu0 %v1655_v30  ;;  %1161 = vmatpush1.bf16.msra.mxu1 %v1658_v31  ;;  %v639_v30 = vrot.slane %v612_v2, %v638_v26  ;;  %v647_v31 = vrot.slane %v612_v2, %v646_v27 }
 0x14f   :  { %1121 = vmatprep.subr.bf16.mxu0 %v1663_v32  ;;  %1162 = vmatprep.subr.bf16.mxu1 %v1666_v33 }
 0x152   :  { %1122 = vmatpush1.bf16.msra.mxu0 %v1661_v34  ;;  %1163 = vmatpush1.bf16.msra.mxu1 %v1664_v35 }
 0x153   :  { %1123 = vmatprep.subr.bf16.mxu0 %v1669_v36  ;;  %1164 = vmatprep.subr.bf16.mxu1 %v1672_v37 }
 0x156   :  { %1124 = vmatpush1.bf16.msra.mxu0 %v1667_v38  ;;  %1165 = vmatpush1.bf16.msra.mxu1 %v1670_v39 }
 0x157   :  { %1125 = vmatprep.subr.bf16.mxu0 %v1675_v40  ;;  %1166 = vmatprep.subr.bf16.mxu1 %v1678_v41 }
 0x15a   :  { %1126 = vmatpush1.bf16.msra.mxu0 %v1673_v43  ;;  %1167 = vmatpush1.bf16.msra.mxu1 %v1676_v44 }
 0x15b   :  { %1546 = vmatprep.subr.bf16.mxu0 %v1795_v46 }
 0x15d   :  { %1144 = vmatmul.mubr.bf16.vlgmr.msra.gmra.mxu0 %v1864_v15  ;;  %1185 = vmatmul.mubr.bf16.vlgmr.msra.gmra.mxu1 %v1864_v15 }
 0x15e   :  { %1547 = vmatpush3.bf16.msra.mxu0 %v1679_v45  ;;  %1562 = vmatprep.mubr.msk.bf16.mxu0 %vm1796_vm1, %v1795_v46 }
 0x15f   :  { %1548 = vmatprep.subr.bf16.mxu0 %v1795_v46 }
 0x162   :  { %1549 = vmatpush3.bf16.msra.mxu0 %v1680_v47 }
 0x163   :  { %1550 = vmatprep.subr.bf16.mxu0 %v1795_v46 }
 0x166   :  { %1551 = vmatpush3.bf16.msra.mxu0 %v1681_v48 }
 0x167   :  { %1552 = vmatprep.subr.bf16.mxu0 %v1795_v46 }
 0x16a   :  { %1553 = vmatpush3.bf16.msra.mxu0 %v1682_v49 }
 0x16b   :  { %1554 = vmatprep.subr.bf16.mxu0 %v1795_v46 }
 0x16e   :  { %1555 = vmatpush3.bf16.msra.mxu0 %v1683_v50 }
 0x16f   :  { %1556 = vmatprep.subr.bf16.mxu0 %v1795_v46 }
 0x172   :  { %1557 = vmatpush3.bf16.msra.mxu0 %v1684_v52 }
 0x173   :  { %1558 = vmatprep.subr.bf16.mxu0 %v1795_v46 }
 0x176   :  { %1559 = vmatpush3.bf16.msra.mxu0 %v1685_v53 }
 0x177   :  { %1560 = vmatprep.subr.bf16.mxu0 %v1795_v46 }
 0x17a   :  { %1561 = vmatpush3.bf16.msra.mxu0 %v1686_v54 }
 0x17d   :  { %1563 = vmatmul.mubr.bf16.vlgmr.msra.gmra.mxu0 %v1864_v15 }
 0x1b9   :  { %v521_v55 = vpop.xlane.xlu0 %520 }
 0x1ba   :  { %v522_v56 = vrot.slane %v521_v55, 4 }
 0x1bc   :  { %v523_v57 = vadd.f32 %v522_v56, %v521_v55 }
 0x1be   :  { %v524_v58 = vrot.slane %v523_v57, 2 }
 0x1c0   :  { %v525_v59 = vadd.f32 %v524_v58, %v523_v57 }
 0x1c2   :  { %v526_v60 = vrot.slane %v525_v59, 1 }
 0x1c4   :  { %v527_v61 = vadd.f32 %v526_v60, %v525_v59 }
 0x1c6   :  { %1566 = vpush %v527_v61 }
 0x1f7   :  { %s1567_s2 = spop %1566 }
 0x1f8   :  { %530 = sst [smem:[#allocation11]] %s1567_s2 }
 0x1f9   :  { %1307 = dma.smem_to_hbm %s1797_s20, 16, %s1905_s7, [#allocation5]  }
 0x1fa   :  { %s1798_s7 = smov [#allocation8]  }
 0x1fb   :  { %s1286_s23 = sshll.u32 %s1798_s7, 4  ;;  %s1287_s23 = int_to_ptr.vmem [resolvable:$true] %s1286_s23 }
 0x1fc   :  { %s1737_s24 = scalar_lea.vmem %s1287_s23, 256  ;;  %p1742_p11 = scmp.lt.s32.totalorder %s1287_s23, %s1287_s23 }
 0x1fd   :  { %v1063_v7 = vpop.f32.mrf.mxu0  ;;  %v1104_v8 = vpop.f32.mrf.mxu1  ;;  %p1738_p10 = scmp.ne.s32.totalorder %s1287_s23, %s1737_s24  ;;  %p1743_p12 = scmp.lt.s32.totalorder %s1737_s24, %s1737_s24 }
 0x1fe   :  { %v1064_v11 = vadd.f32 %v1063_v7, %v619_v3  ;;  %v1105_v12 = vadd.f32 %v1104_v8, %v627_v4 }
 0x1ff   :  { %v1065_v9 = vpop.f32.mrf.mxu0  ;;  %v1106_v10 = vpop.f32.mrf.mxu1  ;;  %p1744_p13 = por %p1743_p12, %p1742_p11 }
 0x200   :  { %v1066_v13 = vadd.f32 %v1065_v9, %v623_v5  ;;  %v1107_v14 = vadd.f32 %v1106_v10, %v631_v6 }
 0x201   :  { %v1067_v15 = vpop.f32.mrf.mxu0  ;;  %v1108_v16 = vpop.f32.mrf.mxu1  ;;  %p1745_p0 = pnand %p1744_p13, %p1738_p10 }
 0x202   :  { %v1241_v17 = vcombine.low %v1064_v11, %v1066_v13  ;;  %v1242_v18 = vcombine.low %v1105_v12, %v1107_v14 }
 0x203   :  { %v1068_v19 = vpop.f32.mrf.mxu0  ;;  %v1109_v20 = vpop.f32.mrf.mxu1 }
 0x204   :  { %v1249_v21 = vrot.slane %v1241_v17, %v1849_v51  ;;  %v1256_v22 = vrot.slane %v1242_v18, %v1849_v51 }
 0x206   :  { %v1257_v23 = vcombine.low %v1249_v21, %v1256_v22 }
 0x208   :  { %1277 = vst [vmem:[#allocation8] sm:$0xff] %v1257_v23 }
 0x21d   :  { %v1145_v32 = vpop.f32.mrf.mxu0  ;;  %v1186_v33 = vpop.f32.mrf.mxu1 }
 0x21e   :  { %v1146_v36 = vadd.f32 %v1145_v32, %v635_v28  ;;  %v1187_v37 = vadd.f32 %v1186_v33, %v643_v29 }
 0x21f   :  { %v1147_v34 = vpop.f32.mrf.mxu0  ;;  %v1188_v35 = vpop.f32.mrf.mxu1 }
 0x220   :  { %v1148_v38 = vadd.f32 %v1147_v34, %v639_v30  ;;  %v1189_v39 = vadd.f32 %v1188_v35, %v647_v31 }
 0x221   :  { %v1149_v40 = vpop.f32.mrf.mxu0  ;;  %v1190_v41 = vpop.f32.mrf.mxu1 }
 0x222   :  { %v1258_v43 = vcombine.low %v1146_v36, %v1148_v38  ;;  %v1259_v44 = vcombine.low %v1187_v37, %v1189_v39 }
 0x223   :  { %v1150_v45 = vpop.f32.mrf.mxu0  ;;  %v1191_v46 = vpop.f32.mrf.mxu1 }
 0x224   :  { %v1266_v42 = vrot.slane %v1258_v43, %v1849_v51  ;;  %v1273_v47 = vrot.slane %v1259_v44, %v1849_v51 }
 0x226   :  { %v1274_v48 = vcombine.low %v1266_v42, %v1273_v47 }
 0x228   :  { %1278 = vst [vmem:[#allocation8 + $0x8] sm:$0xff] %v1274_v48 }
 0x229   :  { %1748 = shalt.err (!%p1745_p0)
}
 0x22a   :  { %1289 = dma.vmem_to_hbm [thread:$0]  %s1287_s23, 256, %s1903_s5, [#allocation4]   ;;  %v1324_v49 = vld [vmem:[%s1902_s4 + $0x8] ss:$0 sm:$0xff] }
 0x22b   :  { %s1799_s29 = smov [#allocation9]  }
 0x22c   :  { %s1296_s30 = sshll.u32 %s1799_s29, 4  ;;  %s1297_s30 = int_to_ptr.vmem [resolvable:$true] %s1296_s30 }
 0x22d   :  { %s1757_s8 = scalar_lea.vmem %s1297_s30, 32  ;;  %p1762_p2 = scmp.lt.s32.totalorder %s1297_s30, %s1297_s30 }
 0x22e   :  { %p1758_p1 = scmp.ne.s32.totalorder %s1297_s30, %s1757_s8  ;;  %p1763_p3 = scmp.lt.s32.totalorder %s1757_s8, %s1757_s8 }
 0x230   :  { %p1764_p4 = por %p1763_p3, %p1762_p2 }
 0x232   :  { %p1765_p5 = pnand %p1764_p4, %p1758_p1 }
 0x23d   :  { %v1227_v51 = vpop.f32.mrf.mxu0 }
 0x23e   :  { %v1228_v50 = vadd.f32 %v1324_v49, %v1227_v51 }
 0x23f   :  { %v1564_v52 = vpop.f32.mrf.mxu0 }
 0x240   :  { %1279 = vst [vmem:[#allocation9] sm:$0x3] %v1228_v50 }
 0x241   :  { %v1230_v53 = vpop.f32.mrf.mxu0 }
 0x242   :  { %1768 = shalt.err (!%p1765_p5)
}
 0x243   :  { %1299 = dma.vmem_to_hbm [thread:$0]  %s1297_s30, 32, %s1904_s6, [#allocation10]   ;;  %v1565_v54 = vpop.f32.mrf.mxu0 }
 0x244   :  { %1781 = dma.done.wait [#allocation4], 256  }
 0x245   :  { %1782 = vsyncadd [#allocation4], 4294967040 }
 0x246   :  { %1783 = dma.done.wait [#allocation10], 32  }
 0x247   :  { %1784 = vsyncadd [#allocation10], 4294967264 }
 0x248   :  { %1785 = dma.done.wait [#allocation5], 16  }
 0x249   :  { %1786 = vsyncadd [#allocation5], 4294967280 }
 0x24a   :  { %1317 = sfence }
 0x24b   :  { %1318 = vsyncpa [#allocation3], 1 }
 0x24c   :  { %1319 = vsyncpa [#allocation7], 1 }
 0x24d   :  { %1320 = vsyncpa [#allocation4], 1 }
 0x24e   :  { %1321 = vsyncpa [#allocation10], 1 }
 0x24f   :  { %1322 = vsyncpa [#allocation5], 1 }

</bundles_post_ra>
